<compile_context>
chip_gen: v6e
topology: v6e:2x2x1
jax: 0.10.0
libtpu: 0.0.40
codegen_flags: <defaults>
</compile_context>

<pallas_src>
import math

import jax
import jax.numpy as jnp
from jax.experimental import pallas as pl
from jax.experimental.pallas import tpu as pltpu


def build_pe_table(d_model: int, max_len: int = 5000, dtype=jnp.float32) -> jnp.ndarray:
    """Sinusoidal table, identical math to the PyTorch __init__ (built once at init)."""
    position = jnp.arange(0, max_len, dtype=jnp.float32)[:, None]          # (max_len, 1)
    div_term = jnp.exp(
        jnp.arange(0, d_model, 2, dtype=jnp.float32)
        * (-math.log(10000.0) / d_model)
    )                                                                       # (d_model/2,)
    pe = jnp.zeros((max_len, d_model), dtype=jnp.float32)
    pe = pe.at[:, 0::2].set(jnp.sin(position * div_term))
    pe = pe.at[:, 1::2].set(jnp.cos(position * div_term))
    return pe.astype(dtype)                                                 # (max_len, d_model)


def _pe_add_kernel(x_ref, pe_ref, o_ref):
    # Single aligned VPU add on matching lane-dense tiles.
    o_ref[...] = x_ref[...] + pe_ref[...]


# ~4 MiB x-blocks: big enough to make the per-grid-step overhead negligible on
# every generation (incl. v7x's fast HBM), small enough that 3 streams x 2
# pipeline buffers stay well inside scoped VMEM on all chips.
_TARGET_BLOCK_BYTES = 4 * 1024 * 1024


def positional_encoding(x: jnp.ndarray, pe_table: jnp.ndarray) -> jnp.ndarray:
    """x: (B, S, D); pe_table: (max_len, D), ideally already in x.dtype.

    Returns x + pe_table[:S] broadcast over the batch dim (same semantics as the
    PyTorch module's forward; the module has no dropout).
    """
    B, S, D = x.shape
    max_len, d_pe = pe_table.shape
    assert d_pe == D, "pe_table d_model mismatch"
    assert S <= max_len, "sequence length exceeds positional-encoding table"
    if pe_table.dtype != x.dtype:
        pe_table = pe_table.astype(x.dtype)   # no-op when table was built in x.dtype

    itemsize = jnp.dtype(x.dtype).itemsize
    # Sublane packing granularity: f32 -> 8 rows, bf16 -> 16, int8/fp8 -> 32.
    gran = max(8, 32 // itemsize)

    # Advisory hint: x read + out write + PE read ONCE (batch-innermost grid keeps
    # the PE tile resident across the batch axis).
    cost = pl.CostEstimate(
        flops=B * S * D,
        transcendentals=0,
        bytes_accessed=2 * B * S * D * itemsize + S * D * itemsize,
    )

    if D % 128 == 0:
        # Already lane-dense: tile the sequence axis; batch dim is Squeezed so the
        # kernel sees matching (ts, D) tiles for x / pe / out.
        max_rows = max(gran, _TARGET_BLOCK_BYTES // (D * itemsize))
        if max_rows >= S:
            ts = S
            if B == 1 and S >= 2 * gran and S % (2 * gran) == 0:
                # Keep >=2 parallel S tiles so both v7x TensorCores get work when
                # the batch axis can't be split.
                ts = S // 2
        else:
            ts = max(gran, (max_rows // gran) * gran)

        # Full-extent but sublane-unaligned tile: slice PE so its block shape
        # equals its full array shape (block-shape legality); otherwise pass the
        # whole table and let the index_map read only the needed tiles.
        pe_in = pe_table if (ts % gran == 0) else pe_table[:S]

        n_s = pl.cdiv(S, ts)
        grid = (n_s, B)                       # batch innermost -> PE tile resident
        in_specs = [
            pl.BlockSpec((pl.Squeezed(), ts, D), lambda s, b: (b, s, 0)),
            pl.BlockSpec((ts, D), lambda s, b: (s, 0)),
        ]
        out_specs = pl.BlockSpec((pl.Squeezed(), ts, D), lambda s, b: (b, s, 0))
        out_shape = jax.ShapeDtypeStruct((B, S, D), x.dtype)
        call_args = (x, pe_in)
        block_bytes = ts * D * itemsize
        post = None
    else:
        # Small / non-128-multiple d_model: flatten (S, D) -> F, pad to a multiple
        # of 128 lanes, and view as (rows, 128) slabs with the batch dim Squeezed.
        # Dense lanes AND dense sublanes (no (B, tf) layout with tiny B).
        L = 128
        F = S * D
        rows = pl.cdiv(F, L)
        Fp = rows * L
        x_flat = x.reshape(B, F)
        pe_flat = pe_table[:S].reshape(F)
        if Fp != F:
            x_flat = jnp.pad(x_flat, ((0, 0), (0, Fp - F)))
            pe_flat = jnp.pad(pe_flat, (0, Fp - F))
        x_r = x_flat.reshape(B, rows, L)
        pe_r = pe_flat.reshape(rows, L)

        max_tr = max(gran, _TARGET_BLOCK_BYTES // (L * itemsize))
        tr = rows if max_tr >= rows else max(gran, (max_tr // gran) * gran)

        n_r = pl.cdiv(rows, tr)
        grid = (n_r, B)                       # batch innermost -> PE tile resident
        in_specs = [
            pl.BlockSpec((pl.Squeezed(), tr, L), lambda r, b: (b, r, 0)),
            pl.BlockSpec((tr, L), lambda r, b: (r, 0)),
        ]
        out_specs = pl.BlockSpec((pl.Squeezed(), tr, L), lambda r, b: (b, r, 0))
        out_shape = jax.ShapeDtypeStruct((B, rows, L), x.dtype)
        call_args = (x_r, pe_r)
        block_bytes = tr * L * itemsize
        post = (F, Fp, (B, S, D))

    # 3 streams (x, pe, out) x 2 pipeline buffers + headroom; overrides v5e's
    # 16 MiB scoped default, capped safely under v7x's 64 MiB physical VMEM.
    vmem_limit = int(min(max(6 * block_bytes + (2 << 20), 16 << 20), 48 << 20))

    out = pl.pallas_call(
        _pe_add_kernel,
        out_shape=out_shape,
        grid=grid,
        in_specs=in_specs,
        out_specs=out_specs,
        cost_estimate=cost,
        compiler_params=pltpu.CompilerParams(
            dimension_semantics=("parallel", "parallel"),
            vmem_limit_bytes=vmem_limit,
        ),
    )(*call_args)

    if post is not None:
        F, Fp, shp = post
        out = out.reshape(B, Fp)
        if Fp != F:
            out = out[:, :F]
        out = out.reshape(shp)
    return out


if __name__ == "__main__":
    # NOTE: at shapes this tiny a fused XLA broadcast-add would beat any standalone
    # kernel; the Pallas path is exercised as the exercise.
    key = jax.random.PRNGKey(0)
    k0, k1 = jax.random.split(key)

    # --- case 1: small d_model (flattened lane-dense path), matches the module spec ---
    batch, seq_len, d_model = 2, 8, 32
    x = jax.random.normal(k0, (batch, seq_len, d_model), dtype=jnp.float32)
    pe_table = build_pe_table(d_model, max_len=5000, dtype=x.dtype)   # built once at "init"
    out = jax.jit(positional_encoding)(x, pe_table)
    out = jax.block_until_ready(out)
    ref = x + pe_table[None, :seq_len, :]
    assert out.shape == x.shape and out.dtype == x.dtype
    assert jnp.allclose(out, ref, atol=1e-6), "mismatch vs reference (flat path)"

    # --- case 2: d_model multiple of 128 (S-tiled, PE-resident path) ---
    d2, s2 = 128, 16
    x2 = jax.random.normal(k1, (batch, s2, d2), dtype=jnp.float32)
    pe_table2 = build_pe_table(d2, max_len=5000, dtype=x2.dtype)
    out2 = jax.jit(positional_encoding)(x2, pe_table2)
    out2 = jax.block_until_ready(out2)
    ref2 = x2 + pe_table2[None, :s2, :]
    assert out2.shape == x2.shape and out2.dtype == x2.dtype
    assert jnp.allclose(out2, ref2, atol=1e-6), "mismatch vs reference (tiled path)"

    print("KERNEL_OK")
</pallas_src>

<mosaic_0001>
module attributes {stable_mosaic.version = 11 : i64} {
  func.func @_pe_add_kernel(%arg0: i32, %arg1: i32, %arg2: memref<1x2x128xf32, #tpu.memory_space<vmem>>, %arg3: memref<2x128xf32, #tpu.memory_space<vmem>>, %arg4: memref<1x2x128xf32, #tpu.memory_space<vmem>>) attributes {dimension_semantics = [#tpu.dimension_semantics<parallel>, #tpu.dimension_semantics<parallel>], iteration_bounds = array<i64: 1, 2>, scalar_prefetch = 0 : i64, scratch_operands = 0 : i64, tpu.core_type = #tpu.core_type<tc>, window_params = [{transform_indices = @transform_0, window_bounds = array<i64: 1, 2, 128>}, {transform_indices = @transform_1, window_bounds = array<i64: 2, 128>}, {transform_indices = @transform_2, window_bounds = array<i64: 1, 2, 128>}]} {
    %c0 = arith.constant 0 : index
    %c0_0 = arith.constant 0 : index
    %c0_1 = arith.constant 0 : index
    %0 = vector.load %arg2[%c0, %c0_0, %c0_1] : memref<1x2x128xf32, #tpu.memory_space<vmem>>, vector<1x2x128xf32>
    %1 = vector.shape_cast %0 : vector<1x2x128xf32> to vector<2x128xf32>
    %c0_2 = arith.constant 0 : index
    %c0_3 = arith.constant 0 : index
    %2 = vector.load %arg3[%c0_2, %c0_3] : memref<2x128xf32, #tpu.memory_space<vmem>>, vector<2x128xf32>
    %3 = arith.addf %1, %2 : vector<2x128xf32>
    %c0_4 = arith.constant 0 : index
    %c0_5 = arith.constant 0 : index
    %c0_6 = arith.constant 0 : index
    %4 = vector.load %arg4[%c0_4, %c0_5, %c0_6] : memref<1x2x128xf32, #tpu.memory_space<vmem>>, vector<1x2x128xf32>
    %5 = vector.shape_cast %4 : vector<1x2x128xf32> to vector<2x128xf32>
    %6 = vector.shape_cast %3 : vector<2x128xf32> to vector<1x2x128xf32>
    tpu.vector_store %arg4[%c0_4, %c0_5, %c0_6], %6 {strides = array<i32>} : memref<1x2x128xf32, #tpu.memory_space<vmem>>, vector<1x2x128xf32>,
    return
  }
  func.func @transform_0(%arg0: i32, %arg1: i32) -> (i32, i32, i32) {
    %c0_i32 = arith.constant 0 : i32
    %c0_i32_0 = arith.constant 0 : i32
    return %arg1, %arg0, %c0_i32 : i32, i32, i32
  }
  func.func @transform_1(%arg0: i32, %arg1: i32) -> (i32, i32) {
    %c0_i32 = arith.constant 0 : i32
    %c0_i32_0 = arith.constant 0 : i32
    return %arg0, %c0_i32 : i32, i32
  }
  func.func @transform_2(%arg0: i32, %arg1: i32) -> (i32, i32, i32) {
    %c0_i32 = arith.constant 0 : i32
    %c0_i32_0 = arith.constant 0 : i32
    return %arg1, %arg0, %c0_i32 : i32, i32, i32
  }
}

</mosaic_0001>

<bundles_post_ra>
// kernel: positional_encoding.1
= control target key start
LH: loop header
LB: loop body
LE: loop exit
PB: predicated region body
PF: predicated region fallthrough
CT: control target
= control target key end

     0   :  { %s354_s9 = smov 0   ;;  %s331_s10 = smov 0   ;;  %s368_s0 = inlined_call_operand.vmem [shape: f32[2,2,128], index: 0, kind: input, shape index: {}]   ;;  %s369_s1 = inlined_call_operand.vmem [shape: f32[2,128], index: 1, kind: input, shape index: {}]   ;;  %s370_s2 = inlined_call_operand.vmem [shape: f32[2,2,128], index: 2, kind: output, shape index: {}]  }
   0x1   :  { %s335_s11 = smov 0  }
   0x2 LB: > { %s21_s12 = sadd.s32 1, %s333_s10  ;;  %p286_p0 = scmp.ge.s32.totalorder %s337_s11, 1  ;;  %s337_s11 = sphi %s335_s11, %s12_s11   ;;  %s333_s10 = sphi %s331_s10, %s332_s10   ;;  %s329_s9 = sphi %s354_s9, %s371_s9  }
   0x3   : > { %p22_p1 = scmp.ge.s32.totalorder %s21_s12, 2  ;;  %p139_p2 = scmp.lt.s32.totalorder %s337_s11, 3 }
   0x5   : > { %s373_s12 = smov (%p22_p1, %s21_s12), 0  ;;  %p140_p3 = pnand %p286_p0, %p139_p2 }
   0x6   : > { %p169_p4 = scmp.lt.s32.totalorder (!%p140_p3), %s329_s9, 1 }
   0x7   : > { %143 = sbr.rel (%p140_p3) target bundleno = 19 (0x13), region = 28 }
   0xc   : > { %s375_s9 = smov (!%p169_p4, %s329_s9), 1  ;;  %v188_v0 = vld [vmem:[%s369_s1] sm:$0x3] }
   0xd   : > { %s287_s13 = sshll.u32 %s375_s9, 1 }
   0xe   : > { %s175_s18 = scalar_lea.vmem %s368_s0, %s287_s13  ;;  %s186_s21 = scalar_lea.vmem %s370_s2, %s287_s13 }
   0xf   : > { %v187_v1 = vld [vmem:[%s175_s18] sm:$0x3] }
  0x10   : > { %v189_v2 = vadd.f32 %v188_v0, %v187_v1 }
  0x12   : > { %190 = vst [vmem:[%s186_s21] sm:$0x3] %v189_v2 }
  0x13 PF: > { %s12_s11 = sadd.s32 1, %s337_s11   ;;  %s371_s9 = smov %s333_s10 }
  0x14   : > { %p9_p5 = scmp.ge.s32.totalorder %s12_s11, 4   ;;  %s332_s10 = smov %s373_s12  }
  0x16   :  { %11 = sbr.rel (!%p9_p5) target bundleno = 2 (0x2), region = 61 }

</bundles_post_ra>
